<compile_context>
chip_gen: v7x
topology: tpu7x:2x2x1
jax: 0.10.0
libtpu: 0.0.40
codegen_flags: <defaults>
</compile_context>

<pallas_src>
import math
import functools

import jax
import jax.numpy as jnp
from jax import lax
from jax.experimental import pallas as pl
from jax.experimental.pallas import tpu as pltpu


def _round_up(x, m):
    return ((x + m - 1) // m) * m


def _swl_kernel(p_ref, g_ref, out_ref, *, t, w, s, c1c2, c2, w_plus_eps,
                inv_eps, need_mask, tail_valid_rows):
    # Elementwise smooth-wing loss on this (TM, L) block; compute in f32.
    diff = jnp.abs(g_ref[...].astype(jnp.float32) -
                   p_ref[...].astype(jnp.float32))

    # Nested selects (2 vselects, no inf*0 NaN hazard), constants folded.
    loss = jnp.where(
        diff < t,
        s * diff * diff,
        jnp.where(diff > w,
                  diff - c1c2,
                  w_plus_eps * jnp.log1p(diff * inv_eps) - c2))

    if need_mask:
        # Only the last grid step has an overhanging (garbage) row tail; pay
        # the iota+compare+select only there.
        last = pl.num_programs(0) - 1

        @pl.when(pl.program_id(0) != last)
        def _():
            out_ref[...] = jnp.sum(loss, axis=0, keepdims=True)[None]

        @pl.when(pl.program_id(0) == last)
        def _():
            rid = lax.broadcasted_iota(jnp.int32, loss.shape, 0)
            masked = jnp.where(rid < tail_valid_rows, loss, 0.0)
            out_ref[...] = jnp.sum(masked, axis=0, keepdims=True)[None]
    else:
        # Per-step partial sum: collapse only the sublane (row) axis here; the
        # cross-lane reduction + mean-over-batch happen once in the wrapper.
        out_ref[...] = jnp.sum(loss, axis=0, keepdims=True)[None]


@functools.partial(jax.jit, static_argnames=("t", "w", "eps", "block_vmem_bytes"))
def smooth_wing_loss(preds, gts, t=0.01, w=10.0, eps=2.0,
                     block_vmem_bytes=4 * 1024 * 1024):
    assert preds.shape == gts.shape, (preds.shape, gts.shape)
    assert preds.ndim == 3, "expected (B, N, D) inputs"
    B, N, D = preds.shape
    total = preds.size
    if total == 0:
        return jnp.zeros((), jnp.float32)

    # ---- zero-copy 2D view (no jnp.pad, no wrapper astype) -----------------
    R = L = None
    for lw in (1024, 512, 256, 128):
        if total % lw == 0:
            R, L = total // lw, lw        # flat lane-dense slab (bitcast reshape)
            break
    if R is None:
        R, L = B * N, D                    # (B, N, D) -> (B*N, D), also bitcast
    p2 = preds.reshape(R, L)
    g2 = gts.reshape(R, L)

    # ---- block geometry -----------------------------------------------------
    itemsize = jnp.dtype(preds.dtype).itemsize
    sub = max(8, 32 // max(1, itemsize))    # sublane multiple (dtype packing)
    vmem_lanes = _round_up(L, 128)          # lane-padded width as seen in VMEM
    # Rows per block from an f32-padded VMEM budget so that the in-kernel f32
    # intermediates stay bounded too (v7x has only 64 MiB physical VMEM).
    tm_budget = max(sub, (block_vmem_bytes // (vmem_lanes * 4)) // sub * sub)
    if R <= tm_budget:
        tm = R                              # whole-array block: legal, no mask
    else:
        tm = tm_budget
    grid = pl.cdiv(R, tm)
    need_mask = (R % tm) != 0
    tail_valid_rows = R - (grid - 1) * tm   # static (shapes are static)

    # ---- constants folded at trace time -------------------------------------
    s = (w + eps) / (2.0 * t * (eps + t))
    c1 = w - (w + eps) * math.log(1.0 + w / eps)
    c2 = s * t * t

    kernel = functools.partial(
        _swl_kernel, t=t, w=w, s=s, c1c2=c1 + c2, c2=c2,
        w_plus_eps=w + eps, inv_eps=1.0 / eps,
        need_mask=need_mask, tail_valid_rows=tail_valid_rows)

    # 2 inputs x 2 pipeline buffers + generous allowance for f32 intermediates.
    in_block_bytes = tm * vmem_lanes * itemsize
    f32_block_bytes = tm * vmem_lanes * 4
    vmem_limit = 2 * 2 * in_block_bytes + 8 * f32_block_bytes + (2 << 20)
    vmem_limit = int(max(32 << 20, min(vmem_limit, 64 << 20)))

    partials = pl.pallas_call(
        kernel,
        out_shape=jax.ShapeDtypeStruct((grid, 1, L), jnp.float32),
        grid_spec=pltpu.PrefetchScalarGridSpec(
            num_scalar_prefetch=0,
            grid=(grid,),
            in_specs=[
                pl.BlockSpec((tm, L), lambda i: (i, 0)),
                pl.BlockSpec((tm, L), lambda i: (i, 0)),
            ],
            out_specs=pl.BlockSpec((1, 1, L), lambda i: (i, 0, 0)),
        ),
        compiler_params=pltpu.CompilerParams(
            dimension_semantics=("parallel",),   # independent partial sums; v7x 2-TC
            vmem_limit_bytes=vmem_limit,
        ),
    )(p2, g2)

    # torch.mean(torch.sum(loss_elements, (2, 1))) == total_sum / B
    return jnp.sum(partials) / jnp.float32(B)


def _reference(preds, gts, t=0.01, w=10.0, eps=2.0):
    s = (w + eps) / (2.0 * t * (eps + t))
    c1 = w - (w + eps) * math.log(1.0 + w / eps)
    c2 = s * t * t
    diff = jnp.abs(gts.astype(jnp.float32) - preds.astype(jnp.float32))
    fc = (diff < t).astype(jnp.float32)
    sc = (diff > w).astype(jnp.float32)
    tc = 1.0 - jnp.maximum(fc, sc)
    fl = s * jnp.square(diff)
    sl = diff - c1 - c2
    tl = (w + eps) * jnp.log1p(diff / eps) - c2
    loss_elements = fl * fc + sl * sc + tl * tc
    return jnp.mean(jnp.sum(loss_elements, axis=(2, 1)))


if __name__ == "__main__":
    key = jax.random.PRNGKey(0)
    k1, k2, k3, k4, k5, k6 = jax.random.split(key, 6)

    # Test 1: small landmark-like shape; total divides 512 -> flat lane-dense
    # zero-copy view, single full-array block, no masking.
    B, N, D = 2, 8, 32
    preds = jax.random.uniform(k1, (B, N, D), jnp.float32, -15.0, 15.0)
    gts = preds + jax.random.uniform(k2, (B, N, D), jnp.float32, -12.0, 12.0)
    loss = jax.block_until_ready(smooth_wing_loss(preds, gts))
    ref = _reference(preds, gts)
    assert jnp.allclose(loss, ref, rtol=1e-5, atol=1e-3), (loss, ref)

    # Test 2: odd shape (total not a multiple of 128) -> zero-copy (B*N, D)
    # view; tiny block budget forces a multi-step grid + masked ragged tail.
    B2, N2, D2 = 3, 257, 5
    preds2 = jax.random.uniform(k3, (B2, N2, D2), jnp.float32, -15.0, 15.0)
    gts2 = preds2 + jax.random.uniform(k4, (B2, N2, D2), jnp.float32, -12.0, 12.0)
    loss2 = jax.block_until_ready(
        smooth_wing_loss(preds2, gts2, block_vmem_bytes=16 * 1024))
    ref2 = _reference(preds2, gts2)
    assert jnp.allclose(loss2, ref2, rtol=1e-4, atol=1e-2), (loss2, ref2)

    # Test 3: bf16 inputs stream as bf16 (no wrapper widening pass); the
    # kernel casts to f32 in-register.
    B3, N3, D3 = 2, 64, 16
    preds3 = jax.random.uniform(
        k5, (B3, N3, D3), jnp.float32, -15.0, 15.0).astype(jnp.bfloat16)
    gts3 = (preds3.astype(jnp.float32) +
            jax.random.uniform(k6, (B3, N3, D3), jnp.float32, -12.0, 12.0)
            ).astype(jnp.bfloat16)
    loss3 = jax.block_until_ready(smooth_wing_loss(preds3, gts3))
    ref3 = _reference(preds3, gts3)
    assert jnp.allclose(loss3, ref3, rtol=1e-4, atol=1e-1), (loss3, ref3)

    print("KERNEL_OK")
</pallas_src>

<mosaic_0001>
module attributes {stable_mosaic.version = 11 : i64} {
  func.func @_swl_kernel(%arg0: i32, %arg1: memref<1x512xf32, #tpu.memory_space<vmem>>, %arg2: memref<1x512xf32, #tpu.memory_space<vmem>>, %arg3: memref<1x1x512xf32, #tpu.memory_space<vmem>>) attributes {dimension_semantics = [#tpu.dimension_semantics<parallel>], iteration_bounds = array<i64: 1>, scalar_prefetch = 0 : i64, scratch_operands = 0 : i64, tpu.core_type = #tpu.core_type<tc>, window_params = [{transform_indices = @transform_0, window_bounds = array<i64: 1, 512>}, {transform_indices = @transform_1, window_bounds = array<i64: 1, 512>}, {transform_indices = @transform_2, window_bounds = array<i64: 1, 1, 512>}]} {
    %c0 = arith.constant 0 : index
    %c0_0 = arith.constant 0 : index
    %0 = vector.load %arg2[%c0, %c0_0] : memref<1x512xf32, #tpu.memory_space<vmem>>, vector<1x512xf32>
    %c0_1 = arith.constant 0 : index
    %c0_2 = arith.constant 0 : index
    %1 = vector.load %arg1[%c0_1, %c0_2] : memref<1x512xf32, #tpu.memory_space<vmem>>, vector<1x512xf32>
    %2 = arith.subf %0, %1 : vector<1x512xf32>
    %3 = math.absf %2 : vector<1x512xf32>
    %cst = arith.constant 0.00999999977 : f32
    %4 = vector.broadcast %cst : f32 to vector<1x512xf32>
    %5 = arith.cmpf olt, %3, %4 : vector<1x512xf32>
    %cst_3 = arith.constant 298.507477 : f32
    %6 = vector.broadcast %cst_3 : f32 to vector<1x512xf32>
    %7 = arith.mulf %6, %3 : vector<1x512xf32>
    %8 = arith.mulf %7, %3 : vector<1x512xf32>
    %cst_4 = arith.constant 1.000000e+01 : f32
    %9 = vector.broadcast %cst_4 : f32 to vector<1x512xf32>
    %10 = arith.cmpf ogt, %3, %9 : vector<1x512xf32>
    %cst_5 = arith.constant -11.4712629 : f32
    %11 = vector.broadcast %cst_5 : f32 to vector<1x512xf32>
    %12 = arith.subf %3, %11 : vector<1x512xf32>
    %cst_6 = arith.constant 5.000000e-01 : f32
    %13 = vector.broadcast %cst_6 : f32 to vector<1x512xf32>
    %14 = arith.mulf %3, %13 : vector<1x512xf32>
    %15 = math.log1p %14 : vector<1x512xf32>
    %cst_7 = arith.constant 1.200000e+01 : f32
    %16 = vector.broadcast %cst_7 : f32 to vector<1x512xf32>
    %17 = arith.mulf %16, %15 : vector<1x512xf32>
    %cst_8 = arith.constant 0.0298507456 : f32
    %18 = vector.broadcast %cst_8 : f32 to vector<1x512xf32>
    %19 = arith.subf %17, %18 : vector<1x512xf32>
    %20 = arith.select %10, %12, %19 : vector<1x512xi1>, vector<1x512xf32>
    %21 = arith.select %5, %8, %20 : vector<1x512xi1>, vector<1x512xf32>
    %cst_9 = arith.constant dense<0.000000e+00> : vector<512xf32>
    %22 = vector.multi_reduction <add>, %21, %cst_9 [0] : vector<1x512xf32> to vector<512xf32>
    %23 = vector.shape_cast %22 : vector<512xf32> to vector<1x512xf32>
    %24 = vector.shape_cast %23 : vector<1x512xf32> to vector<1x1x512xf32>
    %c0_10 = arith.constant 0 : index
    %c0_11 = arith.constant 0 : index
    %c0_12 = arith.constant 0 : index
    %25 = vector.load %arg3[%c0_10, %c0_11, %c0_12] : memref<1x1x512xf32, #tpu.memory_space<vmem>>, vector<1x1x512xf32>
    tpu.vector_store %arg3[%c0_10, %c0_11, %c0_12], %24 {strides = array<i32>} : memref<1x1x512xf32, #tpu.memory_space<vmem>>, vector<1x1x512xf32>,
    return
  }
  func.func @transform_0(%arg0: i32) -> (i32, i32) {
    %c0_i32 = arith.constant 0 : i32
    %c0_i32_0 = arith.constant 0 : i32
    return %arg0, %c0_i32 : i32, i32
  }
  func.func @transform_1(%arg0: i32) -> (i32, i32) {
    %c0_i32 = arith.constant 0 : i32
    %c0_i32_0 = arith.constant 0 : i32
    return %arg0, %c0_i32 : i32, i32
  }
  func.func @transform_2(%arg0: i32) -> (i32, i32, i32) {
    %c0_i32 = arith.constant 0 : i32
    %c0_i32_0 = arith.constant 0 : i32
    %c0_i32_1 = arith.constant 0 : i32
    return %arg0, %c0_i32, %c0_i32_0 : i32, i32, i32
  }
}

</mosaic_0001>

<bundles_post_ra>
// kernel: smooth_wing_loss.1
= control target key start
LH: loop header
LB: loop body
LE: loop exit
PB: predicated region body
PF: predicated region fallthrough
CT: control target
= control target key end

     0   :  { %v35_v14 = vlaneseq  ;;  %s72_s0 = inlined_call_operand.vmem [shape: f32[1,512], index: 0, kind: input, shape index: {}]   ;;  %s73_s1 = inlined_call_operand.vmem [shape: f32[1,512], index: 1, kind: input, shape index: {}]   ;;  %s74_s2 = inlined_call_operand.vmem [shape: f32[1,1,512], index: 2, kind: output, shape index: {}]  }
   0x1   :  { %v11_v0 = vld [vmem:[%s73_s1] sm:$0xf] }
   0x2   :  { %v12_v1 = vld [vmem:[%s72_s0] sm:$0xf]  ;;  %vm37_vm3 = vcmp.lt.s32.totalorder %v35_v14, 512 }
   0x3   :  { %v13_v2 = vsub.f32 %v11_v0, %v12_v1 }
   0x5   :  { %v14_v3 = vand.u32 2147483647, %v13_v2 }
   0x7   :  { %v20_v4 = vmul.f32 0.5, %v14_v3  ;;  %v16_v11 = vmul.f32 298.50748, %v14_v3  ;;  %v44_v15 = vadd.f32 11.471263, %v14_v3  ;;  %vm18_vm1 = vcmp.gt.f32.partialorder %v14_v3, 10.0 }
   0x8   :  { %vm15_vm2 = vcmp.lt.f32.partialorder %v14_v3, 0.01 }
   0x9   :  { %v21_v5 = vadd.f32 1.0, %v20_v4  ;;  %v24_v6 = vmul.f32 -0.5, %v20_v4  ;;  %v27_v8 = vand.u32 2147483647, %v20_v4  ;;  %v17_v17 = vmul.f32 %v16_v11, %v14_v3 }
   0xb   :  { %46 = vlog2.f32 %v21_v5  ;;  %v25_v7 = vadd.f32 1.0, %v24_v6  ;;  %vm28_vm0 = vcmp.lt.f32.partialorder %v27_v8, 0.0004427343 }
   0xd   :  { %v26_v9 = vmul.f32 %v25_v7, %v20_v4 }
  0x15   :  { %v47_v10 = vpop.eup %46 }
  0x16   :  { %v23_v12 = vmul.f32 0.6931472, %v47_v10 }
  0x18   :  { %v29_v13 = vsel %vm28_vm0, %v26_v9, %v23_v12 }
  0x19   :  { %v30_v16 = vmul.f32 12.0, %v29_v13 }
  0x1b   :  { %v45_v18 = vadd.f32 -0.029850746, %v30_v16 }
  0x1d   :  { %v32_v19 = vsel %vm18_vm1, %v44_v15, %v45_v18 }
  0x1e   :  { %v33_v20 = vsel %vm15_vm2, %v17_v17, %v32_v19 }
  0x1f   :  { %39 = vst.msk [vmem:[%s74_s2] sm:$0xf] %vm37_vm3, %v33_v20 }

</bundles_post_ra>
